<compile_context>
chip_gen: v6e
topology: v6e:2x2x1
jax: 0.10.0
libtpu: 0.0.40
codegen_flags: <defaults>
</compile_context>

<pallas_src>
import functools

import jax
import jax.numpy as jnp
from jax.experimental import pallas as pl
from jax.experimental.pallas import tpu as pltpu

_MASK_VAL = -1e30   # additive mask value for non-edges
_M_FLOOR = -1e29    # floor for the running row-max: keeps exp(mask - m) == 0 even when an
                    # entire [dst_tile, src_tile] block has no edges for some dst row.
_NEG_SLOPE = 0.2    # GATConv default LeakyReLU slope


def _cat(xs):
    return xs[0] if len(xs) == 1 else jnp.concatenate(xs, axis=-1)


# ---------------------------------------------------------------------------
# Kernel 1: feature projection + attention logits (row-tiled, "parallel")
# ---------------------------------------------------------------------------
def _project_kernel(x_ref, w_ref, att_ref, h_ref, alpha_ref):
    h = jnp.dot(x_ref[...], w_ref[...], preferred_element_type=jnp.float32)   # [T, H*F]
    h_bf = h.astype(jnp.bfloat16)
    h_ref[...] = h_bf                                                         # bf16 out
    alpha_ref[...] = jnp.dot(h_bf, att_ref[...],
                             preferred_element_type=jnp.float32)              # [T, 2H]


# ---------------------------------------------------------------------------
# Kernel 2: attention + aggregation + bias + ELU  (flash-style online softmax)
#   grid = (dst_tiles "parallel", src_tiles "arbitrary")
# ---------------------------------------------------------------------------
def _gat_attn_kernel(adj_ref, adst_ref, asrct_ref, h_ref, b_ref, out_ref,
                     m_scr, l_scr, acc_scr,
                     *, num_heads, out_ch, use_bf16_exp):
    j = pl.program_id(1)

    @pl.when(j == 0)
    def _():
        m_scr[...] = jnp.full(m_scr.shape, _M_FLOOR, m_scr.dtype)
        l_scr[...] = jnp.zeros(l_scr.shape, l_scr.dtype)
        acc_scr[...] = jnp.zeros(acc_scr.shape, acc_scr.dtype)

    # Edge mask derived per [dst_tile, src_tile] block from the int8 adjacency
    # (i8 -> i32 unpack + compare); no full [N, N] f32 mask is ever materialized.
    edge = adj_ref[...].astype(jnp.int32) > 0            # [TD, TS] bool
    a_dst = adst_ref[...]                                 # [TD, H]  f32
    a_src_t = asrct_ref[...]                              # [H, TS]  f32 (lane-major)
    h_src = h_ref[...]                                    # [TS, H*F] bf16
    m_old = m_scr[...]
    l_old = l_scr[...]
    acc_old = acc_scr[...]

    m_cols, l_cols, acc_blocks = [], [], []
    for hd in range(num_heads):                           # heads are few: fully unrolled
        lo = hd * out_ch
        s = a_dst[:, hd:hd + 1] + a_src_t[hd:hd + 1, :]           # [TD, TS]
        s = jnp.maximum(s, _NEG_SLOPE * s)                        # LeakyReLU(0.2)
        s = jnp.where(edge, s, _MASK_VAL)                         # mask non-edges
        m_new = jnp.maximum(m_old[:, hd:hd + 1],
                            jnp.max(s, axis=-1, keepdims=True))   # always >= _M_FLOOR
        corr = jnp.exp(m_old[:, hd:hd + 1] - m_new)               # [TD, 1]
        d = s - m_new                                             # masked -> <= -9e29 -> exp==0
        if use_bf16_exp:
            p = jnp.exp(d.astype(jnp.bfloat16))                   # bf16 EUP (v6e / v7x)
            p_sum = jnp.sum(p.astype(jnp.float32), axis=-1, keepdims=True)  # f32 accumulation
        else:
            p_f32 = jnp.exp(d)                                    # f32 path (v5e and older)
            p_sum = jnp.sum(p_f32, axis=-1, keepdims=True)
            p = p_f32.astype(jnp.bfloat16)
        l_cols.append(corr * l_old[:, hd:hd + 1] + p_sum)
        # TODO(synk): when hidden/heads scale up, batch the H aggregations with a
        # head-batched dot_general (or 128-wide per-head channels) to feed the MXU.
        agg = jnp.dot(p, h_src[:, lo:lo + out_ch],
                      preferred_element_type=jnp.float32)         # [TD, F]
        acc_blocks.append(corr * acc_old[:, lo:lo + out_ch] + agg)
        m_cols.append(m_new)

    # Whole-scratch, lane-dense writes (no narrow masked stores).
    m_scr[...] = _cat(m_cols)
    l_scr[...] = _cat(l_cols)
    acc_scr[...] = _cat(acc_blocks)

    @pl.when(j == pl.num_programs(1) - 1)
    def _():
        inv_l = pl.reciprocal(l_scr[...], approx=True)            # [TD, H] (EUP slot)
        acc = acc_scr[...]
        outs = [acc[:, hd * out_ch:(hd + 1) * out_ch] * inv_l[:, hd:hd + 1]
                for hd in range(num_heads)]
        o = _cat(outs) + b_ref[...]                               # softmax norm + bias
        o = jnp.where(o > 0, o, jnp.exp(jnp.minimum(o, 0.0)) - 1.0)   # ELU (alpha=1)
        out_ref[...] = o.astype(out_ref.dtype)


# ---------------------------------------------------------------------------
# Kernel 3: global_mean_pool + final Linear (tiny, gridless)
# ---------------------------------------------------------------------------
def _pool_fc_kernel(pool_ref, h_ref, w_ref, b_ref, out_ref):
    pooled = jnp.dot(pool_ref[...], h_ref[...], preferred_element_type=jnp.float32)
    out_ref[...] = (jnp.dot(pooled, w_ref[...], preferred_element_type=jnp.float32)
                    + b_ref[...]).astype(out_ref.dtype)


# ---------------------------------------------------------------------------
# Wrapper
# ---------------------------------------------------------------------------
def _pick_tile(n, target):
    """Largest multiple of 128 <= target that divides n; whole dimension otherwise."""
    if n <= target:
        return n
    t = (target // 128) * 128
    while t >= 128:
        if n % t == 0:
            return t
        t -= 128
    return n


def _gat_layer(x_bf, adj_i8, w, att_blk, bias, *, num_heads, out_ch, out_dtype,
               use_bf16_exp, vmem_limit, td_target, ts_target):
    n, fin = x_bf.shape
    hf = num_heads * out_ch
    td = _pick_tile(n, td_target)
    ts = _pick_tile(n, ts_target)

    w_bf = w.astype(jnp.bfloat16)          # weights enter the kernels as bf16
    att_bf = att_blk.astype(jnp.bfloat16)

    # --- projection + attention logits (row tiles, "parallel") ---
    h, alpha = pl.pallas_call(
        _project_kernel,
        grid=(n // td,),
        in_specs=[pl.BlockSpec((td, fin), lambda i: (i, 0)),
                  pl.BlockSpec((fin, hf), lambda i: (0, 0)),
                  pl.BlockSpec((hf, 2 * num_heads), lambda i: (0, 0))],
        out_specs=[pl.BlockSpec((td, hf), lambda i: (i, 0)),
                   pl.BlockSpec((td, 2 * num_heads), lambda i: (i, 0))],
        out_shape=(jax.ShapeDtypeStruct((n, hf), jnp.bfloat16),
                   jax.ShapeDtypeStruct((n, 2 * num_heads), jnp.float32)),
        compiler_params=pltpu.CompilerParams(
            dimension_semantics=("parallel",), vmem_limit_bytes=vmem_limit),
    )(x_bf, w_bf, att_bf)

    # Layout plumbing only (tiny [N, H] tensors): split dst/src logits and present the
    # source logits lane-major so the attention kernel never transposes per grid step.
    a_dst = alpha[:, :num_heads]                      # [N, H]
    a_src_t = jnp.transpose(alpha[:, num_heads:])     # [H, N]

    flops = 2 * num_heads * n * n * (out_ch + 6)
    transcendentals = num_heads * n * n + n * hf
    bytes_accessed = (n * n                                   # adjacency (int8)
                      + (n // td) * n * hf * 2                # src features re-streamed per dst tile
                      + n * num_heads * 4 * 2                 # logits (f32)
                      + n * hf * jnp.dtype(out_dtype).itemsize)

    # --- attention + aggregation + bias + ELU (dst "parallel" x src "arbitrary") ---
    return pl.pallas_call(
        functools.partial(_gat_attn_kernel, num_heads=num_heads, out_ch=out_ch,
                          use_bf16_exp=use_bf16_exp),
        grid=(n // td, n // ts),
        in_specs=[pl.BlockSpec((td, ts), lambda i, j: (i, j)),           # adjacency (int8)
                  pl.BlockSpec((td, num_heads), lambda i, j: (i, 0)),    # dst logits
                  pl.BlockSpec((num_heads, ts), lambda i, j: (0, j)),    # src logits (lane-major)
                  pl.BlockSpec((ts, hf), lambda i, j: (j, 0)),           # src features (bf16)
                  pl.BlockSpec((1, hf), lambda i, j: (0, 0))],           # bias
        out_specs=pl.BlockSpec((td, hf), lambda i, j: (i, 0)),
        out_shape=jax.ShapeDtypeStruct((n, hf), out_dtype),
        scratch_shapes=[pltpu.VMEM((td, num_heads), jnp.float32),        # running max
                        pltpu.VMEM((td, num_heads), jnp.float32),        # running denom
                        pltpu.VMEM((td, hf), jnp.float32)],              # running numerator
        compiler_params=pltpu.CompilerParams(
            dimension_semantics=("parallel", "arbitrary"),
            vmem_limit_bytes=vmem_limit),
        cost_estimate=pl.CostEstimate(flops=flops, transcendentals=transcendentals,
                                      bytes_accessed=bytes_accessed),
    )(adj_i8, a_dst, a_src_t, h, bias)


def gat_classifier_forward(x, adj_i8, pool, params):
    """GATConv(heads=H)+ELU -> GATConv(heads=1)+ELU -> mean-pool -> Linear (eval mode)."""
    heads, hidden = params["heads"], params["hidden"]
    g = pool.shape[0]
    c = params["fc_w"].shape[1]

    try:
        dk = jax.devices()[0].device_kind.lower()
    except Exception:
        dk = ""
    is_v7 = ("v7" in dk) or ("7x" in dk)
    # bf16 exp only on chips with a bf16 VPU/EUP (v6e / v7x); keep f32 on v5e and older.
    use_bf16_exp = not any(v in dk for v in ("v2", "v3", "v4", "v5"))
    vmem_limit = (48 if is_v7 else 96) * 1024 * 1024
    td_target, ts_target = (256, 512) if is_v7 else (256, 1024)

    x_bf = x.astype(jnp.bfloat16)                     # cast once at the boundary
    h1 = _gat_layer(x_bf, adj_i8, params["w1"], params["att_blk1"], params["b1"],
                    num_heads=heads, out_ch=hidden, out_dtype=jnp.bfloat16,
                    use_bf16_exp=use_bf16_exp, vmem_limit=vmem_limit,
                    td_target=td_target, ts_target=ts_target)
    h2 = _gat_layer(h1, adj_i8, params["w2"], params["att_blk2"], params["b2"],
                    num_heads=1, out_ch=hidden, out_dtype=jnp.float32,
                    use_bf16_exp=use_bf16_exp, vmem_limit=vmem_limit,
                    td_target=td_target, ts_target=ts_target)

    # global_mean_pool + fc ([G,N]@[N,F] then [G,F]@[F,C]) — tiny, one small kernel.
    return pl.pallas_call(
        _pool_fc_kernel,
        out_shape=jax.ShapeDtypeStruct((g, c), jnp.float32),
        in_specs=[pl.BlockSpec(memory_space=pltpu.MemorySpace.VMEM)] * 4,
        out_specs=pl.BlockSpec(memory_space=pltpu.MemorySpace.VMEM),
        compiler_params=pltpu.CompilerParams(vmem_limit_bytes=vmem_limit),
    )(pool, h2, params["fc_w"], params["fc_b"])


# ---------------------------------------------------------------------------
# Deterministic parameter / input construction + pure-JAX reference
# ---------------------------------------------------------------------------
def build_att_block(att_dst, att_src):
    """[H,F] att vectors -> [H*F, 2H] block matrix so that h @ blk = [alpha_dst|alpha_src]."""
    num_heads, out_ch = att_dst.shape
    blk = jnp.zeros((num_heads * out_ch, 2 * num_heads), jnp.float32)
    for hd in range(num_heads):
        blk = blk.at[hd * out_ch:(hd + 1) * out_ch, hd].set(att_dst[hd])
        blk = blk.at[hd * out_ch:(hd + 1) * out_ch, num_heads + hd].set(att_src[hd])
    return blk


def make_params(key, input_dim, hidden_dim, num_heads, num_classes):
    ks = jax.random.split(key, 8)
    glorot = lambda k, shape: (jax.random.normal(k, shape, jnp.float32)
                               * (2.0 / (shape[-2] + shape[-1])) ** 0.5)
    att_src1 = glorot(ks[1], (num_heads, hidden_dim))
    att_dst1 = glorot(ks[2], (num_heads, hidden_dim))
    att_src2 = glorot(ks[4], (1, hidden_dim))
    att_dst2 = glorot(ks[5], (1, hidden_dim))
    return {
        "heads": num_heads,
        "hidden": hidden_dim,
        "w1": glorot(ks[0], (input_dim, num_heads * hidden_dim)),
        "att_blk1": build_att_block(att_dst1, att_src1),           # [H*F, 2H]
        "b1": jnp.zeros((1, num_heads * hidden_dim), jnp.float32),
        "w2": glorot(ks[3], (num_heads * hidden_dim, hidden_dim)),
        "att_blk2": build_att_block(att_dst2, att_src2),           # [F, 2]
        "b2": jnp.zeros((1, hidden_dim), jnp.float32),
        "fc_w": glorot(ks[6], (hidden_dim, num_classes)),
        "fc_b": jnp.zeros((1, num_classes), jnp.float32),
    }


def build_graph(num_nodes, num_graphs):
    """Two small ring graphs; int8 dense adjacency (self-loops added, as GATConv does),
    batch vector, and dense [G, N] mean-pool matrix."""
    per = num_nodes // num_graphs
    src, dst = [], []
    for g in range(num_graphs):
        base = g * per
        for i in range(per):
            a, b = base + i, base + (i + 1) % per
            src += [a, b]
            dst += [b, a]
    edge_index = jnp.array([src, dst], dtype=jnp.int32)
    # edge_attr exists in the data object but is ignored by GATConv (no edge_dim).
    adj = jnp.zeros((num_nodes, num_nodes), jnp.int8)
    adj = adj.at[edge_index[1], edge_index[0]].set(1)                       # adj[dst, src]
    adj = adj.at[jnp.arange(num_nodes), jnp.arange(num_nodes)].set(1)       # self-loops
    batch = jnp.repeat(jnp.arange(num_graphs, dtype=jnp.int32), per)
    onehot = (batch[None, :] == jnp.arange(num_graphs)[:, None]).astype(jnp.float32)
    pool = onehot / jnp.sum(onehot, axis=1, keepdims=True)
    return adj, batch, pool


def _reference_forward(x, adj_i8, pool, params):
    """Pure f32 JAX reference of the module's forward (eval mode)."""
    adj = adj_i8.astype(jnp.float32)

    def gat(xv, w, att_blk, b, heads, f):
        h = xv @ w
        alpha = h @ att_blk
        a_dst, a_src = alpha[:, :heads], alpha[:, heads:]
        outs = []
        for hd in range(heads):
            s = a_dst[:, hd:hd + 1] + a_src[:, hd][None, :]
            s = jnp.where(s > 0, s, _NEG_SLOPE * s)
            s = jnp.where(adj > 0, s, -jnp.inf)
            p = jax.nn.softmax(s, axis=-1)
            outs.append(p @ h[:, hd * f:(hd + 1) * f])
        return jax.nn.elu(jnp.concatenate(outs, axis=-1) + b)

    h1 = gat(x, params["w1"], params["att_blk1"], params["b1"],
             params["heads"], params["hidden"])
    h2 = gat(h1, params["w2"], params["att_blk2"], params["b2"], 1, params["hidden"])
    return pool @ h2 @ params["fc_w"] + params["fc_b"]


if __name__ == "__main__":
    NUM_NODES = 16
    NUM_GRAPHS = 2
    INPUT_DIM = 32
    HIDDEN_DIM = 16
    NUM_HEADS = 4
    NUM_CLASSES = 2

    key = jax.random.PRNGKey(0)
    k_x, k_p = jax.random.split(key)

    x = jax.random.normal(k_x, (NUM_NODES, INPUT_DIM), jnp.float32)
    adj_i8, batch, pool = build_graph(NUM_NODES, NUM_GRAPHS)
    params = make_params(k_p, INPUT_DIM, HIDDEN_DIM, NUM_HEADS, NUM_CLASSES)

    logits = gat_classifier_forward(x, adj_i8, pool, params)
    logits = jax.block_until_ready(logits)
    assert logits.shape == (NUM_GRAPHS, NUM_CLASSES)
    assert bool(jnp.all(jnp.isfinite(logits)))

    # Loose tolerance: kernel runs bf16 MXU / bf16 exp / approx reciprocal vs f32 ref.
    ref = _reference_forward(x, adj_i8, pool, params)
    assert bool(jnp.allclose(logits, ref, atol=1e-1, rtol=1e-1))

    print("KERNEL_OK")
</pallas_src>

<mosaic_0001>
module attributes {stable_mosaic.version = 11 : i64} {
  func.func @_project_kernel(%arg0: i32, %arg1: memref<16x32xbf16, #tpu.memory_space<vmem>>, %arg2: memref<32x64xbf16, #tpu.memory_space<vmem>>, %arg3: memref<64x8xbf16, #tpu.memory_space<vmem>>, %arg4: memref<16x64xbf16, #tpu.memory_space<vmem>>, %arg5: memref<16x8xf32, #tpu.memory_space<vmem>>) attributes {dimension_semantics = [#tpu.dimension_semantics<parallel>], iteration_bounds = array<i64: 1>, scalar_prefetch = 0 : i64, scratch_operands = 0 : i64, tpu.core_type = #tpu.core_type<tc>, window_params = [{transform_indices = @transform_0, window_bounds = array<i64: 16, 32>}, {pipeline_mode = #tpu.pipeline_mode<synchronous>, transform_indices = @transform_1, window_bounds = array<i64: 32, 64>}, {pipeline_mode = #tpu.pipeline_mode<synchronous>, transform_indices = @transform_2, window_bounds = array<i64: 64, 8>}, {transform_indices = @transform_3, window_bounds = array<i64: 16, 64>}, {transform_indices = @transform_4, window_bounds = array<i64: 16, 8>}]} {
    %c0 = arith.constant 0 : index
    %c0_0 = arith.constant 0 : index
    %0 = vector.load %arg1[%c0, %c0_0] : memref<16x32xbf16, #tpu.memory_space<vmem>>, vector<16x32xbf16>
    %c0_1 = arith.constant 0 : index
    %c0_2 = arith.constant 0 : index
    %1 = vector.load %arg2[%c0_1, %c0_2] : memref<32x64xbf16, #tpu.memory_space<vmem>>, vector<32x64xbf16>
    %cst = arith.constant dense<0.000000e+00> : vector<16x64xf32>
    %2 = tpu.matmul %0, %1, %cst {dimension_numbers = #tpu.dot_dimension_numbers<[1], [0], [0], [1], [0, 0, 1, 1], [], []>} : vector<16x32xbf16>, vector<32x64xbf16>, vector<16x64xf32> -> vector<16x64xf32>
    %3 = arith.truncf %2 : vector<16x64xf32> to vector<16x64xbf16>
    %c0_3 = arith.constant 0 : index
    %c0_4 = arith.constant 0 : index
    %4 = vector.load %arg4[%c0_3, %c0_4] : memref<16x64xbf16, #tpu.memory_space<vmem>>, vector<16x64xbf16>
    tpu.vector_store %arg4[%c0_3, %c0_4], %3 {strides = array<i32>} : memref<16x64xbf16, #tpu.memory_space<vmem>>, vector<16x64xbf16>,
    %c0_5 = arith.constant 0 : index
    %c0_6 = arith.constant 0 : index
    %5 = vector.load %arg3[%c0_5, %c0_6] : memref<64x8xbf16, #tpu.memory_space<vmem>>, vector<64x8xbf16>
    %cst_7 = arith.constant dense<0.000000e+00> : vector<16x8xf32>
    %6 = tpu.matmul %3, %5, %cst_7 {dimension_numbers = #tpu.dot_dimension_numbers<[1], [0], [0], [1], [0, 0, 1, 1], [], []>} : vector<16x64xbf16>, vector<64x8xbf16>, vector<16x8xf32> -> vector<16x8xf32>
    %c0_8 = arith.constant 0 : index
    %c0_9 = arith.constant 0 : index
    %7 = vector.load %arg5[%c0_8, %c0_9] : memref<16x8xf32, #tpu.memory_space<vmem>>, vector<16x8xf32>
    tpu.vector_store %arg5[%c0_8, %c0_9], %6 {strides = array<i32>} : memref<16x8xf32, #tpu.memory_space<vmem>>, vector<16x8xf32>,
    return
  }
  func.func @transform_0(%arg0: i32) -> (i32, i32) {
    %c0_i32 = arith.constant 0 : i32
    %c0_i32_0 = arith.constant 0 : i32
    return %arg0, %c0_i32 : i32, i32
  }
  func.func @transform_1(%arg0: i32) -> (i32, i32) {
    %c0_i32 = arith.constant 0 : i32
    %c0_i32_0 = arith.constant 0 : i32
    %c0_i32_1 = arith.constant 0 : i32
    return %c0_i32, %c0_i32_0 : i32, i32
  }
  func.func @transform_2(%arg0: i32) -> (i32, i32) {
    %c0_i32 = arith.constant 0 : i32
    %c0_i32_0 = arith.constant 0 : i32
    %c0_i32_1 = arith.constant 0 : i32
    return %c0_i32, %c0_i32_0 : i32, i32
  }
  func.func @transform_3(%arg0: i32) -> (i32, i32) {
    %c0_i32 = arith.constant 0 : i32
    %c0_i32_0 = arith.constant 0 : i32
    return %arg0, %c0_i32 : i32, i32
  }
  func.func @transform_4(%arg0: i32) -> (i32, i32) {
    %c0_i32 = arith.constant 0 : i32
    %c0_i32_0 = arith.constant 0 : i32
    return %arg0, %c0_i32 : i32, i32
  }
}

</mosaic_0001>

<bundles_post_ra>
// kernel: tpu_custom_call.1
= control target key start
LH: loop header
LB: loop body
LE: loop exit
PB: predicated region body
PF: predicated region fallthrough
CT: control target
= control target key end

     0   :  { %v272_v1 = vmov 0.0   ;;  %vm273_vm0 = vmmov 0   ;;  %vm41_vm1 = vcmask 261120   ;;  %s332_s0 = inlined_call_operand.vmem [shape: bf16[16,32], index: 0, kind: input, shape index: {}]   ;;  %s333_s1 = inlined_call_operand.vmem [shape: bf16[32,64], index: 1, kind: input, shape index: {}]   ;;  %s334_s2 = inlined_call_operand.vmem [shape: bf16[64,8], index: 2, kind: input, shape index: {}]   ;;  %s335_s3 = inlined_call_operand.hbm [shape: bf16[16,64], index: 3, kind: output, shape index: {0}]   ;;  %s336_s4 = inlined_call_operand.vmem [shape: f32[16,8], index: 4, kind: output, shape index: {1}]  }
   0x1   :  { %v243_v0 = vld [vmem:[%s333_s1 + $0x8] sm:$0xff]   ;;  %218 = vmatprep.subr.bf16.mxu0 %v272_v1  ;;  %226 = vmatprep.subr.bf16.mxu1 %v272_v1  ;;  %v244_v2 = vld [vmem:[%s333_s1] sm:$0xff]   ;;  %v246_v4 = vld [vmem:[%s334_s2 + $0x18] sm:$0xff]  }
   0x2   :  { %219 = vmatpush3.bf16.msra.mxu0 %v243_v0  ;;  %222 = vmatprep.mubr.msk.bf16.mxu0 %vm273_vm0, %v272_v1  ;;  %v245_v3 = vld [vmem:[%s332_s0] sm:$0xff]   ;;  %v247_v5 = vld [vmem:[%s334_s2 + $0x10] sm:$0xff]  }
   0x3   :  { %220 = vmatprep.subr.bf16.mxu0 %v272_v1  ;;  %234 = vmatprep.mubr.msk.bf16.mxu1 %vm273_vm0, %v272_v1 }
   0x4   :  { %227 = vmatpush3.bf16.msra.mxu1 %v246_v4 }
   0x5   :  { %228 = vmatprep.subr.bf16.mxu1 %v272_v1 }
   0x6   :  { %221 = vmatpush3.bf16.msra.mxu0 %v244_v2 }
   0x7   :  { %10 = vsyncpa [#allocation3], 0  ;;  %v248_v6 = vld [vmem:[%s334_s2 + $0x8] sm:$0xff]   ;;  %v249_v7 = vld [vmem:[%s334_s2] sm:$0xff]   ;;  %vm94_vm2 = vcmask 519168   ;;  %vm129_vm3 = vcmask 523264  }
   0x8   :  { %229 = vmatpush3.bf16.msra.mxu1 %v247_v5  ;;  %s274_s27 = smov [#allocation2]  }
   0x9   :  { %223 = vmatmul.mubr.msk.bf16.vlgmr.msra.gmra.mxu0 %vm41_vm1, %v245_v3  ;;  %230 = vmatprep.subr.bf16.mxu1 %v272_v1  ;;  %s182_s28 = sshll.u32 %s274_s27, 4  ;;  %s183_s28 = int_to_ptr.vmem [resolvable:$true] %s182_s28 }
   0xa   :  { %s250_s29 = scalar_lea.vmem %s183_s28, 128  ;;  %p255_p1 = scmp.lt.s32.totalorder %s183_s28, %s183_s28 }
   0xb   :  { %p251_p0 = scmp.ne.s32.totalorder %s183_s28, %s250_s29  ;;  %p256_p2 = scmp.lt.s32.totalorder %s250_s29, %s250_s29 }
   0xc   :  { %231 = vmatpush3.bf16.msra.mxu1 %v248_v6 }
   0xd   :  { %232 = vmatprep.subr.bf16.mxu1 %v272_v1  ;;  %p257_p3 = por %p256_p2, %p255_p1 }
   0xf   :  { %p258_p4 = pnand %p257_p3, %p251_p0 }
  0x10   :  { %233 = vmatpush3.bf16.msra.mxu1 %v249_v7 }
  0xc9   :  { %v79_v8 = vpop.f32.mrf.mxu0 }
  0xca   :  { %v208_v9 = vpack.c.bf16 %v79_v8, %v79_v8 }
  0xcb   :  { %v224_v10 = vpop.f32.mrf.mxu0 }
  0xcc   :  { %95 = vst.msk [vmem:[#allocation2] sm:$0xf] %vm94_vm2, %v208_v9 }
  0xcd   :  { %v82_v11 = vpop.f32.mrf.mxu0 }
  0xce   :  { %v86_v12 = vpack.c.bf16 %v82_v11, %v79_v8  ;;  %v209_v13 = vpack.c.bf16 %v82_v11, %v82_v11 }
  0xcf   :  { %v225_v14 = vpop.f32.mrf.mxu0 }
  0xd0   :  { %96 = vst.msk [vmem:[#allocation2 + $0x4] sm:$0xf] %vm94_vm2, %v209_v13  ;;  %235 = vmatmul.mubr.msk.bf16.vlgmr.msra.gmra.mxu1 %vm129_vm3, %v86_v12 }
  0xd1   :  { %261 = shalt.err (!%p258_p4)
}
  0xd2   :  { %s275_s2 = smov 64   ;;  %s276_s30 = smov 4   ;;  %vm174_vm4 = vcmask 64512  }
  0xd3   :  { %188 = dma.vmem_to_hbm [thread:$0]  %s183_s28, 128, %s335_s3, [#allocation3], %s275_s2, %s275_s2, %s276_s30  }
 0x190   :  { %v167_v15 = vpop.f32.mrf.mxu1 }
 0x191   :  { %175 = vst.msk [vmem:[%s336_s4] sm:$0xff] %vm174_vm4, %v167_v15 }
 0x192   :  { %v236_v16 = vpop.f32.mrf.mxu1 }
 0x194   :  { %v170_v17 = vpop.f32.mrf.mxu1 }
 0x195   :  { %176 = vst.msk [vmem:[%s336_s4 + $0x8] sm:$0xff] %vm174_vm4, %v170_v17 }
 0x196   :  { %v237_v18 = vpop.f32.mrf.mxu1 }
 0x197   :  { %270 = dma.done.wait [#allocation3], 128  }
 0x198   :  { %271 = vsyncadd [#allocation3], 4294967168 }
 0x199   :  { %196 = vsyncpa [#allocation3], 1 }

</bundles_post_ra>
